<compile_context>
chip_gen: v6e
topology: v6e:2x2x1
jax: 0.10.0
libtpu: 0.0.40
codegen_flags: <defaults>
</compile_context>

<pallas_src>
import functools

import jax
import jax.numpy as jnp
from jax.experimental import pallas as pl
from jax.experimental.pallas import tpu as pltpu


# --------------------------------------------------------------------------- #
# Kernel
# --------------------------------------------------------------------------- #
def _vae_loss_kernel(recon_ref, x_ref, mu_ref, lv_ref, mse_ref, kl_ref, acc_ref,
                     *, d_true, td, inv_d, needs_mask):
    """Streams (TB, TD) feature tiles; lane-parallel SSE accumulate; KL at end."""
    k = pl.program_id(1)

    @pl.when(k == 0)
    def _():
        acc_ref[...] = jnp.zeros_like(acc_ref)

    tb = acc_ref.shape[0]
    if needs_mask:
        # Global column index of each lane in this tile (only traced when the
        # last feature tile is ragged).
        lane = jax.lax.broadcasted_iota(jnp.int32, (tb, 128), 1)
        col0 = k * td

    # Lane-parallel partial sums: one pure-VPU add per 128-column group, no
    # cross-lane movement in the streaming loop.
    part = None
    n_groups = td // 128
    for c in range(n_groups):
        sl = slice(c * 128, (c + 1) * 128)
        r = recon_ref[:, sl].astype(jnp.float32)
        t = x_ref[:, sl].astype(jnp.float32)
        d = r - t
        if needs_mask:
            # Zero the diff explicitly (select) so undefined VMEM tail columns
            # (possibly NaN/Inf) never reach the square/accumulate.
            d = jnp.where(col0 + (c * 128) + lane < d_true, d, 0.0)
        sq = d * d
        part = sq if part is None else part + sq
    acc_ref[...] += part

    @pl.when(k == pl.num_programs(1) - 1)
    def _():
        # Single 128->1 cross-lane reduce per batch tile; divide by the TRUE D.
        mse_ref[...] = jnp.sum(acc_ref[...], axis=1, keepdims=True) * jnp.float32(inv_d)
        mu = mu_ref[...].astype(jnp.float32)
        lv = lv_ref[...].astype(jnp.float32)
        kl_ref[...] = -0.5 * jnp.sum(1.0 + lv - mu * mu - jnp.exp(lv),
                                     axis=1, keepdims=True)


# --------------------------------------------------------------------------- #
# Tiling heuristics
# --------------------------------------------------------------------------- #
def _round_up(x, m):
    return -(-x // m) * m


def _round_down(x, m):
    return (x // m) * m


def _choose_tiles(B, D, itemsize):
    LANE, SUB = 128, 8
    TARGET = 4 << 20        # ~4 MiB streamed per input per grid step
    TD_MAX = 8192           # caps the unrolled lane-group loop at 64 groups
    TB_MAX = 512

    if B < SUB:
        tb = B                                   # full batch as one block
    else:
        tb = min(_round_down(B, SUB), TB_MAX)
        if B >= 2 * SUB:
            # Keep >= 2 batch-grid steps so both v7x TensorCores get work
            # ("parallel" axis sharding); no-op cost on v5e/v6e.
            tb = min(tb, max(SUB, _round_down(B // 2, SUB)))
        if itemsize == 2 and tb >= 32 and tb % 16:
            tb = _round_down(tb, 16)             # bf16 packs 16 rows per vreg

    d_cols = _round_up(D, LANE)
    td = TARGET // max(tb * itemsize, 1)
    td = _round_down(td, LANE) if td >= LANE else LANE
    td = max(LANE, min(td, min(d_cols, TD_MAX)))
    return tb, td


def _vmem_limit_bytes(tb, td, itemsize, L):
    streamed = 2 * 2 * tb * td * itemsize            # recon + x, double-buffered
    latents = 2 * 2 * tb * max(L, 128) * 4           # mu + log_var
    outs = 2 * 2 * tb * 128 * 4                      # (tb, 1) blocks (lane-padded)
    scratch = tb * 128 * 4                           # accumulator
    need = streamed + latents + outs + scratch
    try:
        cap = getattr(pltpu.get_tpu_info(), "vmem_capacity_bytes", 64 << 20)
    except Exception:
        cap = 64 << 20                               # v7x lower bound (safe)
    return int(min(max(need + (8 << 20), 16 << 20), int(cap * 0.6)))


# --------------------------------------------------------------------------- #
# Wrapper
# --------------------------------------------------------------------------- #
def vae_loss(recon_x, x, mu, log_var, *, lambda_var=0.1, reduction="none",
             tile_b=None, tile_d=None):
    """Pallas implementation of VAELoss.forward((recon_x, mu, log_var), x).

    Implements the usual `mse_loss.dim() > 2` path of the PyTorch module
    (per-sample mean over flattened features).
    """
    assert recon_x.shape == x.shape
    B = x.shape[0]

    # Glue: flatten per-sample features (mirrors mse_loss.view(B, -1)).
    recon2d = recon_x.reshape(B, -1)
    x2d = x.reshape(B, -1)
    D = x2d.shape[1]
    L = mu.shape[1]

    itemsize = jnp.dtype(x2d.dtype).itemsize
    tb, td = _choose_tiles(B, D, itemsize)
    if tile_b is not None:
        tb = tile_b
    if tile_d is not None:
        td = tile_d
    assert td % 128 == 0, td
    assert tb == B or tb % 8 == 0, tb

    grid = (pl.cdiv(B, tb), pl.cdiv(D, td))          # reduction axis LAST
    needs_mask = (D % td) != 0                       # ragged last feature tile?

    kernel = functools.partial(_vae_loss_kernel, d_true=D, td=td,
                               inv_d=1.0 / D, needs_mask=needs_mask)

    mse, kl = pl.pallas_call(
        kernel,
        out_shape=(jax.ShapeDtypeStruct((B, 1), jnp.float32),
                   jax.ShapeDtypeStruct((B, 1), jnp.float32)),
        grid_spec=pltpu.PrefetchScalarGridSpec(
            num_scalar_prefetch=0,
            grid=grid,
            in_specs=[
                pl.BlockSpec((tb, td), lambda i, k: (i, k)),   # recon (streamed)
                pl.BlockSpec((tb, td), lambda i, k: (i, k)),   # x     (streamed)
                pl.BlockSpec((tb, L), lambda i, k: (i, 0)),    # mu    (const in k)
                pl.BlockSpec((tb, L), lambda i, k: (i, 0)),    # log_var
            ],
            out_specs=(
                pl.BlockSpec((tb, 1), lambda i, k: (i, 0)),    # per-sample mse
                pl.BlockSpec((tb, 1), lambda i, k: (i, 0)),    # per-sample kl
            ),
            scratch_shapes=[pltpu.VMEM((tb, 128), jnp.float32)],
        ),
        compiler_params=pltpu.CompilerParams(
            dimension_semantics=("parallel", "arbitrary"),
            vmem_limit_bytes=_vmem_limit_bytes(tb, td, itemsize, L)),
    )(recon2d, x2d, mu, log_var)

    mse = mse[:, 0]
    kl = kl[:, 0]
    loss = mse + kl

    if lambda_var > 0:
        # torch.Tensor.var() default: unbiased (ddof=1) over the batch of
        # per-sample MSEs. NaN for B == 1, matching torch.
        loss = loss + jnp.float32(lambda_var) * jnp.var(mse, ddof=1)

    if reduction == "mean":
        return jnp.mean(loss)
    if reduction == "sum":
        return jnp.sum(loss)
    return loss  # 'none'


# --------------------------------------------------------------------------- #
# Reference + self-test
# --------------------------------------------------------------------------- #
def _reference(recon_x, x, mu, log_var, lambda_var=0.1):
    B = x.shape[0]
    r = recon_x.reshape(B, -1).astype(jnp.float32)
    t = x.reshape(B, -1).astype(jnp.float32)
    mse = jnp.mean((r - t) ** 2, axis=1)
    kl = -0.5 * jnp.sum(1.0 + log_var - mu**2 - jnp.exp(log_var), axis=1)
    loss = mse + kl
    if lambda_var > 0:
        loss = loss + lambda_var * jnp.var(mse, ddof=1)
    return loss


if __name__ == "__main__":
    key = jax.random.PRNGKey(0)
    k1, k2, k3, k4, k5, k6, k7, k8 = jax.random.split(key, 8)

    # --- Case 1: module-typical small shapes (single batch/feature tile). ---
    B, C, H, W, L = 2, 4, 16, 16, 32
    x = jax.random.normal(k1, (B, C, H, W), dtype=jnp.float32)
    recon_x = jax.random.normal(k2, (B, C, H, W), dtype=jnp.float32)
    mu = jax.random.normal(k3, (B, L), dtype=jnp.float32) * 0.5
    log_var = jax.random.normal(k4, (B, L), dtype=jnp.float32) * 0.1

    out = jax.block_until_ready(
        vae_loss(recon_x, x, mu, log_var, lambda_var=0.1, reduction="none"))
    ref = _reference(recon_x, x, mu, log_var, lambda_var=0.1)
    assert out.shape == (B,)
    assert jnp.allclose(out, ref, rtol=1e-5, atol=1e-5), (out, ref)

    # --- Case 2: bf16 inputs, ragged batch (B % TB != 0) and ragged feature
    #     axis (D % 128 != 0), multiple feature tiles -> exercises the cdiv
    #     grid, in-kernel column masking, accumulator and finalize paths. ---
    B2, C2, H2, W2 = 10, 3, 17, 17   # D = 867 (not a multiple of 128)
    x2 = jax.random.normal(k5, (B2, C2, H2, W2), jnp.float32).astype(jnp.bfloat16)
    r2 = jax.random.normal(k6, (B2, C2, H2, W2), jnp.float32).astype(jnp.bfloat16)
    mu2 = jax.random.normal(k7, (B2, L), jnp.float32) * 0.5
    lv2 = jax.random.normal(k8, (B2, L), jnp.float32) * 0.1

    out2 = jax.block_until_ready(
        vae_loss(r2, x2, mu2, lv2, lambda_var=0.1, reduction="none",
                 tile_b=8, tile_d=256))   # force 2 batch steps x 4 feature steps
    ref2 = _reference(r2, x2, mu2, lv2, lambda_var=0.1)
    assert out2.shape == (B2,)
    assert jnp.allclose(out2, ref2, rtol=2e-4, atol=2e-4), (out2, ref2)

    # TODO(synk): the PyTorch `mse_loss.dim() <= 2` branch (elementwise MSE with
    # no per-sample mean) is not implemented; only the standard image path is.
    print("KERNEL_OK")
</pallas_src>

<mosaic_0001>
module attributes {stable_mosaic.version = 11 : i64} {
  func.func @_vae_loss_kernel(%arg0: i32, %arg1: i32, %arg2: memref<2x1024xf32, #tpu.memory_space<vmem>>, %arg3: memref<2x1024xf32, #tpu.memory_space<vmem>>, %arg4: memref<2x32xf32, #tpu.memory_space<vmem>>, %arg5: memref<2x32xf32, #tpu.memory_space<vmem>>, %arg6: memref<2x1xf32, #tpu.memory_space<vmem>>, %arg7: memref<2x1xf32, #tpu.memory_space<vmem>>, %arg8: memref<2x128xf32, #tpu.memory_space<vmem>>) attributes {dimension_semantics = [#tpu.dimension_semantics<parallel>, #tpu.dimension_semantics<arbitrary>], iteration_bounds = array<i64: 1, 1>, scalar_prefetch = 0 : i64, scratch_operands = 1 : i64, tpu.core_type = #tpu.core_type<tc>, window_params = [{transform_indices = @transform_0, window_bounds = array<i64: 2, 1024>}, {transform_indices = @transform_1, window_bounds = array<i64: 2, 1024>}, {transform_indices = @transform_2, window_bounds = array<i64: 2, 32>}, {transform_indices = @transform_3, window_bounds = array<i64: 2, 32>}, {transform_indices = @transform_4, window_bounds = array<i64: 2, 1>}, {transform_indices = @transform_5, window_bounds = array<i64: 2, 1>}]} {
    %c0_i32 = arith.constant 0 : i32
    %0 = arith.cmpi eq, %arg1, %c0_i32 : i32
    %1 = arith.extui %0 : i1 to i32
    %c0_i32_0 = arith.constant 0 : i32
    %2 = arith.cmpi ne, %1, %c0_i32_0 : i32
    scf.if %2 {
      %cst = arith.constant 0.000000e+00 : f32
      %48 = vector.broadcast %cst : f32 to vector<2x128xf32>
      %c0_31 = arith.constant 0 : index
      %c0_32 = arith.constant 0 : index
      %49 = vector.load %arg8[%c0_31, %c0_32] : memref<2x128xf32, #tpu.memory_space<vmem>>, vector<2x128xf32>
      tpu.vector_store %arg8[%c0_31, %c0_32], %48 {strides = array<i32>} : memref<2x128xf32, #tpu.memory_space<vmem>>, vector<2x128xf32>,
    } else {
    }
    %c0 = arith.constant 0 : index
    %c0_1 = arith.constant 0 : index
    %3 = vector.load %arg2[%c0, %c0_1] : memref<2x1024xf32, #tpu.memory_space<vmem>>, vector<2x128xf32>
    %c0_2 = arith.constant 0 : index
    %c0_3 = arith.constant 0 : index
    %4 = vector.load %arg3[%c0_2, %c0_3] : memref<2x1024xf32, #tpu.memory_space<vmem>>, vector<2x128xf32>
    %5 = arith.subf %3, %4 : vector<2x128xf32>
    %6 = arith.mulf %5, %5 : vector<2x128xf32>
    %c0_4 = arith.constant 0 : index
    %c128 = arith.constant 128 : index
    %7 = vector.load %arg2[%c0_4, %c128] : memref<2x1024xf32, #tpu.memory_space<vmem>>, vector<2x128xf32>
    %c0_5 = arith.constant 0 : index
    %c128_6 = arith.constant 128 : index
    %8 = vector.load %arg3[%c0_5, %c128_6] : memref<2x1024xf32, #tpu.memory_space<vmem>>, vector<2x128xf32>
    %9 = arith.subf %7, %8 : vector<2x128xf32>
    %10 = arith.mulf %9, %9 : vector<2x128xf32>
    %11 = arith.addf %6, %10 : vector<2x128xf32>
    %c0_7 = arith.constant 0 : index
    %c256 = arith.constant 256 : index
    %12 = vector.load %arg2[%c0_7, %c256] : memref<2x1024xf32, #tpu.memory_space<vmem>>, vector<2x128xf32>
    %c0_8 = arith.constant 0 : index
    %c256_9 = arith.constant 256 : index
    %13 = vector.load %arg3[%c0_8, %c256_9] : memref<2x1024xf32, #tpu.memory_space<vmem>>, vector<2x128xf32>
    %14 = arith.subf %12, %13 : vector<2x128xf32>
    %15 = arith.mulf %14, %14 : vector<2x128xf32>
    %16 = arith.addf %11, %15 : vector<2x128xf32>
    %c0_10 = arith.constant 0 : index
    %c384 = arith.constant 384 : index
    %17 = vector.load %arg2[%c0_10, %c384] : memref<2x1024xf32, #tpu.memory_space<vmem>>, vector<2x128xf32>
    %c0_11 = arith.constant 0 : index
    %c384_12 = arith.constant 384 : index
    %18 = vector.load %arg3[%c0_11, %c384_12] : memref<2x1024xf32, #tpu.memory_space<vmem>>, vector<2x128xf32>
    %19 = arith.subf %17, %18 : vector<2x128xf32>
    %20 = arith.mulf %19, %19 : vector<2x128xf32>
    %21 = arith.addf %16, %20 : vector<2x128xf32>
    %c0_13 = arith.constant 0 : index
    %c512 = arith.constant 512 : index
    %22 = vector.load %arg2[%c0_13, %c512] : memref<2x1024xf32, #tpu.memory_space<vmem>>, vector<2x128xf32>
    %c0_14 = arith.constant 0 : index
    %c512_15 = arith.constant 512 : index
    %23 = vector.load %arg3[%c0_14, %c512_15] : memref<2x1024xf32, #tpu.memory_space<vmem>>, vector<2x128xf32>
    %24 = arith.subf %22, %23 : vector<2x128xf32>
    %25 = arith.mulf %24, %24 : vector<2x128xf32>
    %26 = arith.addf %21, %25 : vector<2x128xf32>
    %c0_16 = arith.constant 0 : index
    %c640 = arith.constant 640 : index
    %27 = vector.load %arg2[%c0_16, %c640] : memref<2x1024xf32, #tpu.memory_space<vmem>>, vector<2x128xf32>
    %c0_17 = arith.constant 0 : index
    %c640_18 = arith.constant 640 : index
    %28 = vector.load %arg3[%c0_17, %c640_18] : memref<2x1024xf32, #tpu.memory_space<vmem>>, vector<2x128xf32>
    %29 = arith.subf %27, %28 : vector<2x128xf32>
    %30 = arith.mulf %29, %29 : vector<2x128xf32>
    %31 = arith.addf %26, %30 : vector<2x128xf32>
    %c0_19 = arith.constant 0 : index
    %c768 = arith.constant 768 : index
    %32 = vector.load %arg2[%c0_19, %c768] : memref<2x1024xf32, #tpu.memory_space<vmem>>, vector<2x128xf32>
    %c0_20 = arith.constant 0 : index
    %c768_21 = arith.constant 768 : index
    %33 = vector.load %arg3[%c0_20, %c768_21] : memref<2x1024xf32, #tpu.memory_space<vmem>>, vector<2x128xf32>
    %34 = arith.subf %32, %33 : vector<2x128xf32>
    %35 = arith.mulf %34, %34 : vector<2x128xf32>
    %36 = arith.addf %31, %35 : vector<2x128xf32>
    %c0_22 = arith.constant 0 : index
    %c896 = arith.constant 896 : index
    %37 = vector.load %arg2[%c0_22, %c896] : memref<2x1024xf32, #tpu.memory_space<vmem>>, vector<2x128xf32>
    %c0_23 = arith.constant 0 : index
    %c896_24 = arith.constant 896 : index
    %38 = vector.load %arg3[%c0_23, %c896_24] : memref<2x1024xf32, #tpu.memory_space<vmem>>, vector<2x128xf32>
    %39 = arith.subf %37, %38 : vector<2x128xf32>
    %40 = arith.mulf %39, %39 : vector<2x128xf32>
    %41 = arith.addf %36, %40 : vector<2x128xf32>
    %c0_25 = arith.constant 0 : index
    %c0_26 = arith.constant 0 : index
    %42 = vector.load %arg8[%c0_25, %c0_26] : memref<2x128xf32, #tpu.memory_space<vmem>>, vector<2x128xf32>
    %43 = arith.addf %42, %41 : vector<2x128xf32>
    %c0_27 = arith.constant 0 : index
    %c0_28 = arith.constant 0 : index
    %44 = vector.load %arg8[%c0_27, %c0_28] : memref<2x128xf32, #tpu.memory_space<vmem>>, vector<2x128xf32>
    tpu.vector_store %arg8[%c0_27, %c0_28], %43 {strides = array<i32>} : memref<2x128xf32, #tpu.memory_space<vmem>>, vector<2x128xf32>,
    %c0_i32_29 = arith.constant 0 : i32
    %45 = arith.cmpi eq, %arg1, %c0_i32_29 : i32
    %46 = arith.extui %45 : i1 to i32
    %c0_i32_30 = arith.constant 0 : i32
    %47 = arith.cmpi ne, %46, %c0_i32_30 : i32
    scf.if %47 {
      %c0_31 = arith.constant 0 : index
      %c0_32 = arith.constant 0 : index
      %48 = vector.load %arg8[%c0_31, %c0_32] : memref<2x128xf32, #tpu.memory_space<vmem>>, vector<2x128xf32>
      %cst = arith.constant dense<0.000000e+00> : vector<2xf32>
      %49 = vector.multi_reduction <add>, %48, %cst [1] : vector<2x128xf32> to vector<2xf32>
      %50 = vector.shape_cast %49 : vector<2xf32> to vector<2x1xf32>
      %cst_33 = arith.constant 9.765625E-4 : f32
      %51 = vector.broadcast %cst_33 : f32 to vector<2x1xf32>
      %52 = arith.mulf %50, %51 : vector<2x1xf32>
      %c0_34 = arith.constant 0 : index
      %c0_35 = arith.constant 0 : index
      %53 = vector.load %arg6[%c0_34, %c0_35] : memref<2x1xf32, #tpu.memory_space<vmem>>, vector<2x1xf32>
      tpu.vector_store %arg6[%c0_34, %c0_35], %52 {strides = array<i32>} : memref<2x1xf32, #tpu.memory_space<vmem>>, vector<2x1xf32>,
      %c0_36 = arith.constant 0 : index
      %c0_37 = arith.constant 0 : index
      %54 = vector.load %arg4[%c0_36, %c0_37] : memref<2x32xf32, #tpu.memory_space<vmem>>, vector<2x32xf32>
      %c0_38 = arith.constant 0 : index
      %c0_39 = arith.constant 0 : index
      %55 = vector.load %arg5[%c0_38, %c0_39] : memref<2x32xf32, #tpu.memory_space<vmem>>, vector<2x32xf32>
      %cst_40 = arith.constant 1.000000e+00 : f32
      %56 = vector.broadcast %cst_40 : f32 to vector<2x32xf32>
      %57 = arith.addf %56, %55 : vector<2x32xf32>
      %58 = arith.mulf %54, %54 : vector<2x32xf32>
      %59 = arith.subf %57, %58 : vector<2x32xf32>
      %60 = math.exp %55 : vector<2x32xf32>
      %61 = arith.subf %59, %60 : vector<2x32xf32>
      %cst_41 = arith.constant dense<0.000000e+00> : vector<2xf32>
      %62 = vector.multi_reduction <add>, %61, %cst_41 [1] : vector<2x32xf32> to vector<2xf32>
      %63 = vector.shape_cast %62 : vector<2xf32> to vector<2x1xf32>
      %cst_42 = arith.constant -5.000000e-01 : f32
      %64 = vector.broadcast %cst_42 : f32 to vector<2x1xf32>
      %65 = arith.mulf %64, %63 : vector<2x1xf32>
      %c0_43 = arith.constant 0 : index
      %c0_44 = arith.constant 0 : index
      %66 = vector.load %arg7[%c0_43, %c0_44] : memref<2x1xf32, #tpu.memory_space<vmem>>, vector<2x1xf32>
      tpu.vector_store %arg7[%c0_43, %c0_44], %65 {strides = array<i32>} : memref<2x1xf32, #tpu.memory_space<vmem>>, vector<2x1xf32>,
    } else {
    }
    return
  }
  func.func @transform_0(%arg0: i32, %arg1: i32) -> (i32, i32) {
    %c0_i32 = arith.constant 0 : i32
    return %arg0, %arg1 : i32, i32
  }
  func.func @transform_1(%arg0: i32, %arg1: i32) -> (i32, i32) {
    %c0_i32 = arith.constant 0 : i32
    return %arg0, %arg1 : i32, i32
  }
  func.func @transform_2(%arg0: i32, %arg1: i32) -> (i32, i32) {
    %c0_i32 = arith.constant 0 : i32
    %c0_i32_0 = arith.constant 0 : i32
    return %arg0, %c0_i32 : i32, i32
  }
  func.func @transform_3(%arg0: i32, %arg1: i32) -> (i32, i32) {
    %c0_i32 = arith.constant 0 : i32
    %c0_i32_0 = arith.constant 0 : i32
    return %arg0, %c0_i32 : i32, i32
  }
  func.func @transform_4(%arg0: i32, %arg1: i32) -> (i32, i32) {
    %c0_i32 = arith.constant 0 : i32
    %c0_i32_0 = arith.constant 0 : i32
    return %arg0, %c0_i32 : i32, i32
  }
  func.func @transform_5(%arg0: i32, %arg1: i32) -> (i32, i32) {
    %c0_i32 = arith.constant 0 : i32
    %c0_i32_0 = arith.constant 0 : i32
    return %arg0, %c0_i32 : i32, i32
  }
}

</mosaic_0001>

<bundles_post_ra>
// kernel: tpu_custom_call.1
= control target key start
LH: loop header
LB: loop body
LE: loop exit
PB: predicated region body
PF: predicated region fallthrough
CT: control target
= control target key end

     0   :  { %11 = vsyncpa [#allocation4], 0  ;;  %s225_s0 = inlined_call_operand.hbm [shape: f32[2,1024], index: 0, kind: input, shape index: {}]   ;;  %s226_s1 = inlined_call_operand.hbm [shape: f32[2,1024], index: 1, kind: input, shape index: {}]   ;;  %s227_s2 = inlined_call_operand.vmem [shape: f32[2,32], index: 2, kind: input, shape index: {}]   ;;  %s228_s3 = inlined_call_operand.vmem [shape: f32[2,32], index: 3, kind: input, shape index: {}]   ;;  %s229_s4 = inlined_call_operand.vmem [shape: f32[2,1], index: 4, kind: output, shape index: {0}]   ;;  %s230_s5 = inlined_call_operand.vmem [shape: f32[2,1], index: 5, kind: output, shape index: {1}]  }
   0x1   :  { %12 = vsyncpa [#allocation6], 0  ;;  %s174_s18 = smov [#allocation3]   ;;  %s175_s20 = smov [#allocation5]  }
   0x2   :  { %s19_s19 = sshll.u32 %s174_s18, 4  ;;  %s29_s21 = sshll.u32 %s175_s20, 4  ;;  %s20_s19 = int_to_ptr.vmem [resolvable:$true] %s19_s19  ;;  %s30_s21 = int_to_ptr.vmem [resolvable:$true] %s29_s21 }
   0x3   :  { %s138_s22 = scalar_lea.vmem %s20_s19, 256  ;;  %p143_p1 = scmp.lt.s32.totalorder %s20_s19, %s20_s19 }
   0x4   :  { %p139_p0 = scmp.ne.s32.totalorder %s20_s19, %s138_s22  ;;  %p144_p2 = scmp.lt.s32.totalorder %s138_s22, %s138_s22 }
   0x6   :  { %p145_p3 = por %p144_p2, %p143_p1 }
   0x8   :  { %p146_p4 = pnand %p145_p3, %p139_p0 }
   0xa   :  { %149 = shalt.err (!%p146_p4)
}
   0xb   :  { %22 = dma.hbm_to_vmem [thread:$0]  %s225_s0, 256, %s20_s19, [#allocation4]  }
   0xc   :  { %s158_s25 = scalar_lea.vmem %s30_s21, 256  ;;  %p163_p6 = scmp.lt.s32.totalorder %s30_s21, %s30_s21 }
   0xd   :  { %p159_p5 = scmp.ne.s32.totalorder %s30_s21, %s158_s25  ;;  %p164_p7 = scmp.lt.s32.totalorder %s158_s25, %s158_s25 }
   0xf   :  { %p165_p8 = por %p164_p7, %p163_p6 }
  0x11   :  { %p166_p9 = pnand %p165_p8, %p159_p5 }
  0x13   :  { %169 = shalt.err (!%p166_p9)
}
  0x14   :  { %32 = dma.hbm_to_vmem [thread:$0]  %s226_s1, 256, %s30_s21, [#allocation6]  }
  0x15   :  { %170 = dma.done.wait [#allocation4], 256  }
  0x16   :  { %171 = vsyncadd [#allocation4], 4294967040 }
  0x17   :  { %172 = dma.done.wait [#allocation6], 256  }
  0x18   :  { %173 = vsyncadd [#allocation6], 4294967040  ;;  %v176_v0 = vmov 0.0   ;;  %v48_v1 = vld [vmem:[#allocation3] sm:$0x3]  ;;  %vm94_vm0 = vcmask 1041408  }
  0x19   :  { %47 = vst [vmem:[#allocation2] sm:$0x3] %v176_v0  ;;  %v49_v2 = vld [vmem:[#allocation5] sm:$0x3]  ;;  %v52_v3 = vld [vmem:[#allocation3 + $0x2] sm:$0x3] }
  0x1a   :  { %v50_v4 = vsub.f32 %v48_v1, %v49_v2  ;;  %v53_v5 = vld [vmem:[#allocation5 + $0x2] sm:$0x3]  ;;  %v57_v6 = vld [vmem:[#allocation3 + $0x4] sm:$0x3]  ;;  %v58_v7 = vld [vmem:[#allocation5 + $0x4] sm:$0x3] }
  0x1b   :  { %v54_v8 = vsub.f32 %v52_v3, %v53_v5  ;;  %v59_v9 = vsub.f32 %v57_v6, %v58_v7  ;;  %v62_v10 = vld [vmem:[#allocation3 + $0x6] sm:$0x3]  ;;  %v63_v11 = vld [vmem:[#allocation5 + $0x6] sm:$0x3]  ;;  %v67_v12 = vld [vmem:[#allocation3 + $0x8] sm:$0x3] }
  0x1c   :  { %v51_v13 = vmul.f32 %v50_v4, %v50_v4  ;;  %v64_v14 = vsub.f32 %v62_v10, %v63_v11  ;;  %v68_v15 = vld [vmem:[#allocation5 + $0x8] sm:$0x3]  ;;  %v72_v16 = vld [vmem:[#allocation3 + $0xa] sm:$0x3]  ;;  %v73_v17 = vld [vmem:[#allocation5 + $0xa] sm:$0x3] }
  0x1d   :  { %v55_v18 = vmul.f32 %v54_v8, %v54_v8  ;;  %v60_v19 = vmul.f32 %v59_v9, %v59_v9  ;;  %v69_v20 = vsub.f32 %v67_v12, %v68_v15  ;;  %v77_v21 = vld [vmem:[#allocation3 + $0xc] sm:$0x3]  ;;  %v78_v22 = vld [vmem:[#allocation5 + $0xc] sm:$0x3]  ;;  %v74_v25 = vsub.f32 %v72_v16, %v73_v17  ;;  %v102_v26 = vld [vmem:[%s228_s3] sm:$0x3] }
  0x1e   :  { %v65_v24 = vmul.f32 %v64_v14, %v64_v14  ;;  %v82_v27 = vld [vmem:[#allocation3 + $0xe] sm:$0x3]  ;;  %v83_v28 = vld [vmem:[#allocation5 + $0xe] sm:$0x3]  ;;  %v79_v31 = vsub.f32 %v77_v21, %v78_v22  ;;  %v106_v32 = vmul.f32 1.442695, %v102_v26 }
  0x1f   :  { %v56_v23 = vadd.f32 %v55_v18, %v51_v13  ;;  %v70_v30 = vmul.f32 %v69_v20, %v69_v20  ;;  %v75_v34 = vmul.f32 %v74_v25, %v74_v25  ;;  %v84_v35 = vsub.f32 %v82_v27, %v83_v28  ;;  %v101_v42 = vld [vmem:[%s227_s2] sm:$0x3] }
  0x20   :  { %v80_v37 = vmul.f32 %v79_v31, %v79_v31  ;;  %128 = vpow2.f32 %v106_v32  ;;  %v87_v41 = vld [vmem:[#allocation2] sm:$0x3]  ;;  %v103_v45 = vadd.f32 1.0, %v102_v26  ;;  %v104_v46 = vmul.f32 %v101_v42, %v101_v42 }
  0x21   :  { %v61_v29 = vadd.f32 %v60_v19, %v56_v23  ;;  %v85_v39 = vmul.f32 %v84_v35, %v84_v35  ;;  %vm109_vm1 = vcmask 254976   ;;  %vm99_vm2 = vcmask 1024  }
  0x22   :  { %v105_v47 = vsub.f32 %v103_v45, %v104_v46 }
  0x23   :  { %v66_v33 = vadd.f32 %v65_v24, %v61_v29 }
  0x25   :  { %v71_v36 = vadd.f32 %v70_v30, %v66_v33 }
  0x27   :  { %v76_v38 = vadd.f32 %v75_v34, %v71_v36 }
  0x29   :  { %v81_v40 = vadd.f32 %v80_v37, %v76_v38 }
  0x2b   :  { %v86_v43 = vadd.f32 %v85_v39, %v81_v40 }
  0x2d   :  { %v88_v44 = vadd.f32 %v87_v41, %v86_v43  ;;  %v129_v48 = vpop.eup %128 }
  0x2e   :  { %v108_v49 = vsub.f32 %v105_v47, %v129_v48 }
  0x2f   :  { %89 = vst [vmem:[#allocation2] sm:$0x3] %v88_v44 }
  0x30   :  { %v110_v52 = vsel %vm109_vm1, %v108_v49, 0.0 }
  0x36   :  { %v93_v50 = vld [vmem:[#allocation2] sm:$0x3] }
  0x37   :  { %v95_v51 = vsel %vm94_vm0, %v93_v50, 0.0 }
  0x38   :  { %96 = vadd.xlane.f32.xlu0 %v95_v51 }
  0x3c   :  { %111 = vadd.xlane.f32.xlu0 %v110_v52 }
  0xc1   :  { %v97_v53 = vpop.xlane.xlu0 %96 }
  0xc2   :  { %v98_v54 = vmul.f32 0.0009765625, %v97_v53 }
  0xc4   :  { %100 = vst.msk [vmem:[%s229_s4] sm:$0x3] %vm99_vm2, %v98_v54 }
  0xc5   :  { %v112_v55 = vpop.xlane.xlu0 %111 }
  0xc6   :  { %v113_v56 = vmul.f32 -0.5, %v112_v55 }
  0xc8   :  { %114 = vst.msk [vmem:[%s230_s5] sm:$0x3] %vm99_vm2, %v113_v56 }
  0xc9   :  { %123 = vsyncpa [#allocation4], 1 }
  0xca   :  { %124 = vsyncpa [#allocation6], 1 }

</bundles_post_ra>
